<compile_context>
chip_gen: v7x
topology: tpu7x:2x2x1
jax: 0.10.0
libtpu: 0.0.40
codegen_flags: <defaults>
</compile_context>

<pallas_src>
import functools

import jax
import jax.numpy as jnp
from jax.experimental import pallas as pl
from jax.experimental.pallas import tpu as pltpu


def _round_up(x, m):
    return ((x + m - 1) // m) * m


def _fnet_kernel(x_ref, w23_ref, vec_ref, o_ref, *, act_dtype):
    dim_in = x_ref.shape[0]
    dim_out = o_ref.shape[0]

    x = x_ref[...]                                   # [dim_in, bc]  (lane dense)
    vec = vec_ref[...]                               # [num_pad, C]  f32 slab
    c = 0
    w1 = vec[:, c:c + dim_in]; c += dim_in           # [num_pad, dim_in]
    b1 = vec[:, c:c + 1]; c += 1                     # [num_pad, 1]
    b2 = vec[:, c:c + 1]; c += 1
    b3 = vec[:, c:c + 1]; c += 1
    w4 = vec[:, c:c + dim_out]; c += dim_out         # [num_pad, dim_out]
    b4 = vec[:dim_out, c:c + 1]                      # [dim_out, 1]

    # ---- layer 1: Linear(dim_in, num) ----
    if dim_in == 1:
        # degenerate K=1 matmul -> broadcast multiply-add on the VPU
        h = w1 * x + b1                              # [num_pad, bc]
    else:
        h = jnp.dot(w1.astype(act_dtype), x.astype(act_dtype),
                    preferred_element_type=jnp.float32) + b1
    # jnp.tanh rides the EUP slot on TPU (native transcendental) -- no rewrite needed.
    h = jnp.tanh(h)

    # ---- layers 2 & 3: Linear(num, num) on the MXU ----
    w2 = w23_ref[0].astype(act_dtype)                # [num_pad, num_pad]
    w3 = w23_ref[1].astype(act_dtype)
    h = jnp.tanh(jnp.dot(w2, h.astype(act_dtype),
                         preferred_element_type=jnp.float32) + b2)
    h = jnp.tanh(jnp.dot(w3, h.astype(act_dtype),
                         preferred_element_type=jnp.float32) + b3)

    # ---- layer 4: Linear(num, dim_out) ----
    if dim_out == 1:
        # degenerate N=1 matmul -> multiply + sublane reduction (VPU + XLU)
        y = jnp.sum(w4 * h, axis=0, keepdims=True) + b4          # [1, bc]
    else:
        y = jax.lax.dot_general(w4.astype(act_dtype), h.astype(act_dtype),
                                (((0,), (0,)), ((), ())),
                                preferred_element_type=jnp.float32) + b4

    o_ref[...] = y.astype(o_ref.dtype)               # lane-dense store [dim_out, bc]


def fnet_forward(x, params, *, block_cols=4096, use_bf16=False):
    """x: [N, dim_input] float32. params: dict of [in,out] weights / [1,out] biases."""
    N, dim_in = x.shape
    num = params["w1"].shape[1]
    dim_out = params["w4"].shape[1]

    num_pad = _round_up(num, 8)                      # 30 -> 32 sublanes
    pad_h = num_pad - num

    # ---- weight packing: 8 arrays -> 2 resident slabs (fewer pipelined inputs) ----
    # w23: [2, num_pad, num_pad] (transposed so matmuls are  W @ [feat, batch])
    w23 = jnp.stack([
        jnp.pad(params["w2"].T, ((0, pad_h), (0, pad_h))),
        jnp.pad(params["w3"].T, ((0, pad_h), (0, pad_h))),
    ]).astype(jnp.float32)

    # vec slab: [num_pad, dim_in + 3 + dim_out + 1]
    #   lane-concatenated columns:  w1^T | b1 | b2 | b3 | w4 | b4(rows [0,dim_out))
    b4_col = jnp.zeros((num_pad, 1), jnp.float32).at[:dim_out, 0].set(params["b4"][0, :])
    vec = jnp.concatenate([
        jnp.pad(params["w1"].T, ((0, pad_h), (0, 0))),          # [num_pad, dim_in]
        jnp.pad(params["b1"].T, ((0, pad_h), (0, 0))),          # [num_pad, 1]
        jnp.pad(params["b2"].T, ((0, pad_h), (0, 0))),
        jnp.pad(params["b3"].T, ((0, pad_h), (0, 0))),
        jnp.pad(params["w4"],   ((0, pad_h), (0, 0))),          # [num_pad, dim_out]
        b4_col,
    ], axis=1).astype(jnp.float32)

    # ---- batch tiling: big lane tiles; keep >=2 grid steps when N allows so the
    #      "parallel" axis can shard across v7x's two TensorCores. ----
    N_pad = _round_up(N, 128)                 # pad only to a lane multiple;
    bc = _round_up(block_cols, 128)           # a partial last tile covers the rest.
    if N_pad >= 256:
        bc = min(bc, _round_up(pl.cdiv(N_pad, 2), 128))
    bc = max(128, min(bc, N_pad))
    grid = (pl.cdiv(N_pad, bc),)

    act_dtype = jnp.bfloat16 if use_bf16 else jnp.float32
    # TODO(synk): for callers that already hold x / consume out in the lane-dense
    # [features, batch] layout, skip this pad/transpose and the final slice/transpose.
    x_t = jnp.pad(x.T.astype(act_dtype if use_bf16 else jnp.float32),
                  ((0, 0), (0, N_pad - N)))                      # [dim_in, N_pad]

    cost = pl.CostEstimate(
        flops=2 * N_pad * (num * dim_in + 2 * num * num + num * dim_out),
        transcendentals=3 * num * N_pad,
        bytes_accessed=(int(x_t.size) * x_t.dtype.itemsize
                        + 4 * dim_out * N_pad
                        + 4 * (int(w23.size) + int(vec.size))),
    )

    out_t = pl.pallas_call(
        functools.partial(_fnet_kernel, act_dtype=act_dtype),
        out_shape=jax.ShapeDtypeStruct((dim_out, N_pad), jnp.float32),
        grid_spec=pltpu.PrefetchScalarGridSpec(
            num_scalar_prefetch=0,
            grid=grid,
            in_specs=[
                pl.BlockSpec((dim_in, bc), lambda i: (0, i)),    # lane-dense x tile
                pl.BlockSpec(w23.shape, lambda i: (0, 0, 0)),    # resident weights
                pl.BlockSpec(vec.shape, lambda i: (0, 0)),       # resident vectors
            ],
            out_specs=pl.BlockSpec((dim_out, bc), lambda i: (0, i)),
        ),
        compiler_params=pltpu.CompilerParams(
            dimension_semantics=("parallel",)),
        cost_estimate=cost,
    )(x_t, w23, vec)

    return out_t[:, :N].T                                        # back to [N, dim_out]


def init_fnet_params(key, num=30, dim_input=1, dim_output=1):
    """Deterministic init mimicking PyTorch nn.Linear default (U(-1/sqrt(fan_in), +))."""
    ks = jax.random.split(key, 8)

    def lin(kw, kb, fan_in, fan_out):
        bound = 1.0 / jnp.sqrt(jnp.float32(fan_in))
        w = jax.random.uniform(kw, (fan_in, fan_out), jnp.float32, -bound, bound)
        b = jax.random.uniform(kb, (1, fan_out), jnp.float32, -bound, bound)
        return w, b

    w1, b1 = lin(ks[0], ks[1], dim_input, num)
    w2, b2 = lin(ks[2], ks[3], num, num)
    w3, b3 = lin(ks[4], ks[5], num, num)
    w4, b4 = lin(ks[6], ks[7], num, dim_output)
    return {"w1": w1, "b1": b1, "w2": w2, "b2": b2,
            "w3": w3, "b3": b3, "w4": w4, "b4": b4}


def fnet_reference(x, p):
    h = jnp.tanh(x @ p["w1"] + p["b1"])
    h = jnp.tanh(h @ p["w2"] + p["b2"])
    h = jnp.tanh(h @ p["w3"] + p["b3"])
    return h @ p["w4"] + p["b4"]


if __name__ == "__main__":
    key = jax.random.PRNGKey(0)
    k_param, k_x, k_x2 = jax.random.split(key, 3)

    num, dim_input, dim_output = 30, 1, 1
    params = init_fnet_params(k_param, num=num, dim_input=dim_input,
                              dim_output=dim_output)

    # Case 1: small batch, single grid step.
    N = 64
    x = jax.random.uniform(k_x, (N, dim_input), jnp.float32, -1.0, 1.0)
    out = jax.block_until_ready(fnet_forward(x, params))
    ref = fnet_reference(x, params)
    assert out.shape == (N, dim_output)
    assert jnp.allclose(out, ref, atol=1e-5, rtol=1e-5), "mismatch vs reference (N=64)"

    # Case 2: multi-step grid with a partial last tile (exercises the >=2-step /
    # non-divisible-N path used for megacore sharding on v7x).
    N2 = 300
    x2 = jax.random.uniform(k_x2, (N2, dim_input), jnp.float32, -1.0, 1.0)
    out2 = jax.block_until_ready(fnet_forward(x2, params, block_cols=256))
    ref2 = fnet_reference(x2, params)
    assert out2.shape == (N2, dim_output)
    assert jnp.allclose(out2, ref2, atol=1e-5, rtol=1e-5), "mismatch vs reference (N=300)"

    print("KERNEL_OK")
</pallas_src>

<mosaic_0001>
module attributes {stable_mosaic.version = 11 : i64} {
  func.func @_fnet_kernel(%arg0: i32, %arg1: memref<1x128xf32, #tpu.memory_space<vmem>>, %arg2: memref<2x32x32xf32, #tpu.memory_space<vmem>>, %arg3: memref<32x6xf32, #tpu.memory_space<vmem>>, %arg4: memref<1x128xf32, #tpu.memory_space<vmem>>) attributes {dimension_semantics = [#tpu.dimension_semantics<parallel>], iteration_bounds = array<i64: 1>, scalar_prefetch = 0 : i64, scratch_operands = 0 : i64, tpu.core_type = #tpu.core_type<tc>, window_params = [{transform_indices = @transform_0, window_bounds = array<i64: 1, 128>}, {pipeline_mode = #tpu.pipeline_mode<synchronous>, transform_indices = @transform_1, window_bounds = array<i64: 2, 32, 32>}, {pipeline_mode = #tpu.pipeline_mode<synchronous>, transform_indices = @transform_2, window_bounds = array<i64: 32, 6>}, {transform_indices = @transform_3, window_bounds = array<i64: 1, 128>}]} {
    %c0 = arith.constant 0 : index
    %c0_0 = arith.constant 0 : index
    %0 = vector.load %arg1[%c0, %c0_0] : memref<1x128xf32, #tpu.memory_space<vmem>>, vector<1x128xf32>
    %c0_1 = arith.constant 0 : index
    %c0_2 = arith.constant 0 : index
    %1 = vector.load %arg3[%c0_1, %c0_2] : memref<32x6xf32, #tpu.memory_space<vmem>>, vector<32x6xf32>
    %2 = vector.extract_strided_slice %1 {offsets = [0, 0], sizes = [32, 1], strides = [1, 1]} : vector<32x6xf32> to vector<32x1xf32>
    %3 = vector.extract_strided_slice %1 {offsets = [0, 1], sizes = [32, 1], strides = [1, 1]} : vector<32x6xf32> to vector<32x1xf32>
    %4 = vector.extract_strided_slice %1 {offsets = [0, 2], sizes = [32, 1], strides = [1, 1]} : vector<32x6xf32> to vector<32x1xf32>
    %5 = vector.extract_strided_slice %1 {offsets = [0, 3], sizes = [32, 1], strides = [1, 1]} : vector<32x6xf32> to vector<32x1xf32>
    %6 = vector.extract_strided_slice %1 {offsets = [0, 4], sizes = [32, 1], strides = [1, 1]} : vector<32x6xf32> to vector<32x1xf32>
    %7 = vector.extract_strided_slice %1 {offsets = [0, 5], sizes = [1, 1], strides = [1, 1]} : vector<32x6xf32> to vector<1x1xf32>
    %8 = vector.broadcast %2 : vector<32x1xf32> to vector<32x128xf32>
    %9 = vector.broadcast %0 : vector<1x128xf32> to vector<32x128xf32>
    %10 = arith.mulf %8, %9 : vector<32x128xf32>
    %11 = vector.broadcast %3 : vector<32x1xf32> to vector<32x128xf32>
    %12 = arith.addf %10, %11 : vector<32x128xf32>
    %13 = math.tanh %12 : vector<32x128xf32>
    %c0_3 = arith.constant 0 : index
    %c0_4 = arith.constant 0 : index
    %c0_5 = arith.constant 0 : index
    %14 = vector.load %arg2[%c0_3, %c0_4, %c0_5] : memref<2x32x32xf32, #tpu.memory_space<vmem>>, vector<1x32x32xf32>
    %15 = vector.shape_cast %14 : vector<1x32x32xf32> to vector<32x32xf32>
    %c1 = arith.constant 1 : index
    %c0_6 = arith.constant 0 : index
    %c0_7 = arith.constant 0 : index
    %16 = vector.load %arg2[%c1, %c0_6, %c0_7] : memref<2x32x32xf32, #tpu.memory_space<vmem>>, vector<1x32x32xf32>
    %17 = vector.shape_cast %16 : vector<1x32x32xf32> to vector<32x32xf32>
    %cst = arith.constant dense<0.000000e+00> : vector<32x128xf32>
    %18 = tpu.matmul %15, %13, %cst {dimension_numbers = #tpu.dot_dimension_numbers<[1], [0], [0], [1], [0, 0, 1, 1], [], []>} : vector<32x32xf32>, vector<32x128xf32>, vector<32x128xf32> -> vector<32x128xf32>
    %19 = vector.broadcast %4 : vector<32x1xf32> to vector<32x128xf32>
    %20 = arith.addf %18, %19 : vector<32x128xf32>
    %21 = math.tanh %20 : vector<32x128xf32>
    %cst_8 = arith.constant dense<0.000000e+00> : vector<32x128xf32>
    %22 = tpu.matmul %17, %21, %cst_8 {dimension_numbers = #tpu.dot_dimension_numbers<[1], [0], [0], [1], [0, 0, 1, 1], [], []>} : vector<32x32xf32>, vector<32x128xf32>, vector<32x128xf32> -> vector<32x128xf32>
    %23 = vector.broadcast %5 : vector<32x1xf32> to vector<32x128xf32>
    %24 = arith.addf %22, %23 : vector<32x128xf32>
    %25 = math.tanh %24 : vector<32x128xf32>
    %26 = vector.broadcast %6 : vector<32x1xf32> to vector<32x128xf32>
    %27 = arith.mulf %26, %25 : vector<32x128xf32>
    %cst_9 = arith.constant dense<0.000000e+00> : vector<128xf32>
    %28 = vector.multi_reduction <add>, %27, %cst_9 [0] : vector<32x128xf32> to vector<128xf32>
    %29 = vector.shape_cast %28 : vector<128xf32> to vector<1x128xf32>
    %30 = vector.broadcast %7 : vector<1x1xf32> to vector<1x128xf32>
    %31 = arith.addf %29, %30 : vector<1x128xf32>
    %c0_10 = arith.constant 0 : index
    %c0_11 = arith.constant 0 : index
    %32 = vector.load %arg4[%c0_10, %c0_11] : memref<1x128xf32, #tpu.memory_space<vmem>>, vector<1x128xf32>
    tpu.vector_store %arg4[%c0_10, %c0_11], %31 {strides = array<i32>} : memref<1x128xf32, #tpu.memory_space<vmem>>, vector<1x128xf32>,
    return
  }
  func.func @transform_0(%arg0: i32) -> (i32, i32) {
    %c0_i32 = arith.constant 0 : i32
    %c0_i32_0 = arith.constant 0 : i32
    return %c0_i32, %arg0 : i32, i32
  }
  func.func @transform_1(%arg0: i32) -> (i32, i32, i32) {
    %c0_i32 = arith.constant 0 : i32
    %c0_i32_0 = arith.constant 0 : i32
    %c0_i32_1 = arith.constant 0 : i32
    %c0_i32_2 = arith.constant 0 : i32
    return %c0_i32, %c0_i32_0, %c0_i32_1 : i32, i32, i32
  }
  func.func @transform_2(%arg0: i32) -> (i32, i32) {
    %c0_i32 = arith.constant 0 : i32
    %c0_i32_0 = arith.constant 0 : i32
    %c0_i32_1 = arith.constant 0 : i32
    return %c0_i32, %c0_i32_0 : i32, i32
  }
  func.func @transform_3(%arg0: i32) -> (i32, i32) {
    %c0_i32 = arith.constant 0 : i32
    %c0_i32_0 = arith.constant 0 : i32
    return %c0_i32, %arg0 : i32, i32
  }
}

</mosaic_0001>

<bundles_post_ra>
// kernel: tpu_custom_call.1
= control target key start
LH: loop header
LB: loop body
LE: loop exit
PB: predicated region body
PF: predicated region fallthrough
CT: control target
= control target key end

     0   :  { %8 = vsyncpa [#allocation3], 0  ;;  %s651_s0 = inlined_call_operand.vmem [shape: f32[1,128], index: 0, kind: input, shape index: {}]   ;;  %s652_s1 = inlined_call_operand.hbm [shape: f32[2,32,32], index: 1, kind: input, shape index: {}]   ;;  %s653_s2 = inlined_call_operand.vmem [shape: f32[32,6], index: 2, kind: input, shape index: {}]   ;;  %s654_s3 = inlined_call_operand.hbm [shape: f32[1,128], index: 3, kind: output, shape index: {}]  }
   0x1   :  { %9 = vsyncpa [#allocation4], 0  ;;  %s545_s12 = smov [#allocation2]   ;;  %s497_s16 = scalar_lea.hbm %s652_s1, 1024 }
   0x2   :  { %s17_s13 = sshll.u32 %s545_s12, 4  ;;  %p498_p0 = scmp.ne.s32.totalorder %s652_s1, %s497_s16  ;;  %s18_s13 = int_to_ptr.vmem [resolvable:$true] %s17_s13 }
   0x3   :  { %p501_p1 = scmp.lt.u32.totalorder %s497_s16, %s652_s1 }
   0x5   :  { %p503_p2 = pnand %p501_p1, %p498_p0 }
   0x7   :  { %506 = shalt.err (!%p503_p2)
}
   0x8   :  { %s507_s21 = scalar_lea.vmem %s18_s13, 1024  ;;  %p512_p4 = scmp.lt.s32.totalorder %s18_s13, %s18_s13 }
   0x9   :  { %p508_p3 = scmp.ne.s32.totalorder %s18_s13, %s507_s21  ;;  %p513_p5 = scmp.lt.s32.totalorder %s507_s21, %s507_s21 }
   0xb   :  { %p514_p6 = por %p513_p5, %p512_p4 }
   0xd   :  { %p515_p7 = pnand %p514_p6, %p508_p3 }
   0xf   :  { %518 = shalt.err (!%p515_p7)
}
  0x10   :  { %s546_s22 = smov 128   ;;  %s547_s23 = smov 8  }
  0x11   :  { %23 = dma.hbm_to_vmem [thread:$0]  %s652_s1, 1024, %s18_s13, [#allocation3], %s546_s22, %s546_s22, %s547_s23  }
  0x12   :  { %541 = dma.done.wait [#allocation3], 1024  }
  0x13   :  { %542 = vsyncadd [#allocation3], 4294966272  ;;  %v548_v0 = vmov 1   ;;  %v549_v1 = vmov 0   ;;  %v590_v2 = vld [vmem:[%s653_s2] sm:$0xff]  ;;  %v597_v3 = vld [vmem:[%s653_s2 + $0x8] sm:$0xff] }
  0x14   :  { %462 = vset.pattern.permute.xlu1 %v548_v0  ;;  %461 = vset.pattern.permute.xlu0 %v549_v1  ;;  %v604_v4 = vld [vmem:[%s653_s2 + $0x10] sm:$0xff]  ;;  %v609_v5 = vld [vmem:[%s653_s2 + $0x18] sm:$0xff]  ;;  %v88_v6 = vld [vmem:[#allocation2] sm:$0xff]  ;;  %vm113_vm0 = vcmask 261120   ;;  %v550_v7 = vmov 2   ;;  %v551_v35 = vmov 3  }
  0x15   :  { %65 = vperm.xlu1 %462, %v590_v2   ;;  %36 = vperm.xlu0 %461, %v590_v2   ;;  %v382_v8 = vld [vmem:[%s651_s0] ss:$0 sm:$0xff]  ;;  %v89_v31 = vld [vmem:[#allocation2 + $0x8] sm:$0xff]  ;;  %v90_v32 = vld [vmem:[#allocation2 + $0x10] sm:$0xff]  ;;  %v552_v36 = vmov 4   ;;  %v553_v37 = vmov 5  }
  0x16   :  { %415 = vmatprep.mubr.msk.f32.mxu0 %vm113_vm0, %v88_v6  ;;  %v91_v33 = vld [vmem:[#allocation2 + $0x18] sm:$0xff]  ;;  %v93_v34 = vld [vmem:[#allocation2 + $0x20] sm:$0xff]  ;;  %v94_v56 = vld [vmem:[#allocation2 + $0x28] sm:$0xff]  ;;  %s554_s0 = smov [#allocation5]  }
  0x17   :  { %429 = vmatprep.mubr.msk.f32.mxu1 %vm113_vm0, %v93_v34  ;;  %v95_v57 = vld [vmem:[#allocation2 + $0x30] sm:$0xff]  ;;  %v96_v58 = vld [vmem:[#allocation2 + $0x38] sm:$0xff]  ;;  %s373_s7 = sshll.u32 %s554_s0, 4  ;;  %s374_s7 = int_to_ptr.vmem [resolvable:$true] %s373_s7 }
  0x18   :  { %s519_s8 = scalar_lea.vmem %s374_s7, 16  ;;  %s523_s9 = scalar_lea.vmem %s374_s7, 32 }
  0x19   :  { %69 = vperm.xlu1 %462, %v597_v3   ;;  %41 = vperm.xlu0 %461, %v597_v3   ;;  %p520_p8 = scmp.ne.s32.totalorder %s374_s7, %s519_s8  ;;  %p524_p9 = scmp.lt.s32.totalorder %s374_s7, %s374_s7 }
  0x1a   :  { %p525_p10 = scmp.lt.s32.totalorder %s523_s9, %s519_s8 }
  0x1c   :  { %p526_p11 = por %p525_p10, %p524_p9 }
  0x1d   :  { %463 = vset.pattern.permute.xlu1 %v549_v1  ;;  %46 = vperm.xlu0 %461, %v604_v4  }
  0x1e   :  { %51 = vperm.xlu1 %463, %v609_v5   ;;  %p527_p12 = pnand %p526_p11, %p520_p8 }
  0x21   :  { %464 = vset.pattern.permute.xlu0 %v548_v0 }
  0x22   :  { %465 = vset.pattern.permute.xlu1 %v548_v0  ;;  %73 = vperm.xlu0 %464, %v604_v4  }
  0x23   :  { %77 = vperm.xlu1 %465, %v609_v5  }
  0x26   :  { %467 = vset.pattern.permute.xlu0 %v550_v7 }
  0x27   :  { %466 = vset.pattern.permute.xlu1 %v550_v7  ;;  %102 = vperm.xlu0 %467, %v597_v3  }
  0x28   :  { %98 = vperm.xlu1 %466, %v590_v2  }
  0x2b   :  { %468 = vset.pattern.permute.xlu0 %v551_v35 }
  0x2c   :  { %106 = vperm.xlu1 %466, %v604_v4   ;;  %216 = vperm.xlu0 %468, %v590_v2  }
  0x30   :  { %110 = vperm.xlu1 %466, %v609_v5   ;;  %228 = vperm.xlu0 %468, %v609_v5  }
  0x34   :  { %469 = vset.pattern.permute.xlu1 %v551_v35  ;;  %471 = vset.pattern.permute.xlu0 %v552_v36 }
  0x35   :  { %220 = vperm.xlu1 %469, %v597_v3   ;;  %337 = vperm.xlu0 %471, %v597_v3  }
  0x39   :  { %224 = vperm.xlu1 %469, %v604_v4   ;;  %472 = vset.pattern.permute.xlu0 %v553_v37 }
  0x3a   :  { %362 = vperm.xlu0 %472, %v590_v2  }
  0x3d   :  { %470 = vset.pattern.permute.xlu1 %v552_v36 }
  0x3e   :  { %333 = vperm.xlu1 %470, %v590_v2  }
  0x42   :  { %341 = vperm.xlu1 %470, %v604_v4  }
  0x46   :  { %345 = vperm.xlu1 %470, %v609_v5  }
  0x94   :  { %v66_v9 = vpop.permute.xlu1 %65  ;;  %v37_v10 = vpop.permute.xlu0 %36 }
  0x95   :  { %v60_v11 = vmul.f32 %v382_v8, %v37_v10 }
  0x97   :  { %v80_v12 = vadd.f32 %v66_v9, %v60_v11 }
  0x98   :  { %v70_v13 = vpop.permute.xlu1 %69  ;;  %v42_v14 = vpop.permute.xlu0 %41 }
  0x99   :  { %v61_v15 = vmul.f32 %v382_v8, %v42_v14  ;;  %473 = vtanh.f32 %v80_v12 }
  0x9b   :  { %v81_v16 = vadd.f32 %v70_v13, %v61_v15 }
  0x9c   :  { %v47_v17 = vpop.permute.xlu0 %46 }
  0x9d   :  { %475 = vtanh.f32 %v81_v16  ;;  %v52_v18 = vpop.permute.xlu1 %51  ;;  %v62_v19 = vmul.f32 %v382_v8, %v47_v17 }
  0x9e   :  { %v63_v20 = vmul.f32 %v382_v8, %v52_v18 }
  0xa1   :  { %v74_v21 = vpop.permute.xlu0 %73 }
  0xa2   :  { %v82_v22 = vadd.f32 %v74_v21, %v62_v19  ;;  %v78_v23 = vpop.permute.xlu1 %77 }
  0xa3   :  { %v83_v24 = vadd.f32 %v78_v23, %v63_v20  ;;  %v474_v25 = vpop.eup %473 }
  0xa4   :  { %477 = vtanh.f32 %v82_v22 }
  0xa5   :  { %479 = vtanh.f32 %v83_v24 }
  0xa6   :  { %v103_v40 = vpop.permute.xlu0 %102 }
  0xa7   :  { %v476_v26 = vpop.eup %475  ;;  %v99_v38 = vpop.permute.xlu1 %98 }
  0xa8   :  { %v435_v27 = vpack.c.bf16 %v476_v26, %v474_v25 }
  0xaa   :  { %436 = vmatprep.subr.bf16.mxu0 %v435_v27 }
  0xab   :  { %438 = vmatpush3.bf16.msra.mxu0 %v435_v27  ;;  %v107_v39 = vpop.permute.xlu1 %106  ;;  %v217_v60 = vpop.permute.xlu0 %216 }
  0xae   :  { %v478_v28 = vpop.eup %477 }
  0xaf   :  { %v480_v29 = vpop.eup %479  ;;  %v111_v45 = vpop.permute.xlu1 %110 }
  0xb0   :  { %v439_v30 = vpack.c.bf16 %v480_v29, %v478_v28  ;;  %v229_v2 = vpop.permute.xlu0 %228 }
  0xb2   :  { %440 = vmatprep.subr.bf16.mxu0 %v439_v30 }
  0xb3   :  { %442 = vmatpush3.bf16.msra.mxu0 %v439_v30 }
  0xb4   :  { %v221_v59 = vpop.permute.xlu1 %220  ;;  %v338_v8 = vpop.permute.xlu0 %337 }
  0xb6   :  { %416 = vmatmul.mubr.msk.f32.vlgmr.msra.gmra.mrb[0].mxu0 %vm113_vm0, %v89_v31 }
  0xb7   :  { %418 = vmatprep.mubr.msk.f32.mxu0 %vm113_vm0, %v90_v32 }
  0xb8   :  { %v225_v0 = vpop.permute.xlu1 %224 }
  0xb9   :  { %v363_v27 = vpop.permute.xlu0 %362 }
  0xba   :  { %419 = vmatmul.mubr.msk.f32.gmra.mrb[2].mxu0 %vm113_vm0, %v91_v33 }
  0xbd   :  { %v334_v7 = vpop.permute.xlu1 %333 }
  0xc1   :  { %v342_v11 = vpop.permute.xlu1 %341 }
  0xc5   :  { %v346_v18 = vpop.permute.xlu1 %345 }
 0x189   :  { %v417_v41 = vpop.f32.mrb[0].mxu0 }
 0x18a   :  { %v198_v42 = vadd.f32 %v417_v41, %v103_v40  ;;  %v192_v43 = vpop.f32.mrb[1].mxu0 }
 0x18b   :  { %v193_v44 = vadd.f32 %v192_v43, %v99_v38 }
 0x18c   :  { %481 = vtanh.f32 %v198_v42 }
 0x18d   :  { %483 = vtanh.f32 %v193_v44  ;;  %v420_v46 = vpop.f32.mrb[2].mxu0 }
 0x18e   :  { %v208_v47 = vadd.f32 %v420_v46, %v111_v45  ;;  %v202_v48 = vpop.f32.mrb[3].mxu0 }
 0x18f   :  { %v203_v49 = vadd.f32 %v202_v48, %v107_v39 }
 0x190   :  { %485 = vtanh.f32 %v208_v47 }
 0x191   :  { %487 = vtanh.f32 %v203_v49 }
 0x196   :  { %v482_v50 = vpop.eup %481 }
 0x197   :  { %v484_v51 = vpop.eup %483 }
 0x198   :  { %v443_v52 = vpack.c.bf16 %v482_v50, %v484_v51 }
 0x19a   :  { %v486_v53 = vpop.eup %485  ;;  %444 = vmatprep.subr.bf16.mxu1 %v443_v52 }
 0x19b   :  { %v488_v54 = vpop.eup %487  ;;  %446 = vmatpush3.bf16.msra.mxu1 %v443_v52 }
 0x19c   :  { %v447_v55 = vpack.c.bf16 %v486_v53, %v488_v54 }
 0x19e   :  { %448 = vmatprep.subr.bf16.mxu1 %v447_v55 }
 0x19f   :  { %450 = vmatpush3.bf16.msra.mxu1 %v447_v55 }
 0x1a2   :  { %430 = vmatmul.mubr.msk.f32.vlgmr.msra.gmra.mrb[0].mxu1 %vm113_vm0, %v94_v56 }
 0x1a3   :  { %432 = vmatprep.mubr.msk.f32.mxu1 %vm113_vm0, %v95_v57 }
 0x1a6   :  { %433 = vmatmul.mubr.msk.f32.gmra.mrb[2].mxu1 %vm113_vm0, %v96_v58 }
 0x275   :  { %v431_v61 = vpop.f32.mrb[0].mxu1 }
 0x276   :  { %v315_v62 = vadd.f32 %v431_v61, %v221_v59  ;;  %v309_v63 = vpop.f32.mrb[1].mxu1 }
 0x277   :  { %v310_v1 = vadd.f32 %v309_v63, %v217_v60 }
 0x278   :  { %489 = vtanh.f32 %v315_v62 }
 0x279   :  { %491 = vtanh.f32 %v310_v1  ;;  %v434_v3 = vpop.f32.mrb[2].mxu1 }
 0x27a   :  { %v325_v4 = vadd.f32 %v434_v3, %v229_v2  ;;  %v319_v5 = vpop.f32.mrb[3].mxu1 }
 0x27b   :  { %v320_v6 = vadd.f32 %v319_v5, %v225_v0 }
 0x27c   :  { %493 = vtanh.f32 %v325_v4 }
 0x27d   :  { %495 = vtanh.f32 %v320_v6 }
 0x282   :  { %v490_v9 = vpop.eup %489 }
 0x283   :  { %v492_v10 = vpop.eup %491  ;;  %v349_v12 = vmul.f32 %v490_v9, %v338_v8 }
 0x284   :  { %v348_v13 = vmul.f32 %v492_v10, %v334_v7 }
 0x286   :  { %v494_v14 = vpop.eup %493  ;;  %v352_v15 = vadd.f32 %v349_v12, %v348_v13 }
 0x287   :  { %v496_v16 = vpop.eup %495  ;;  %v351_v19 = vmul.f32 %v494_v14, %v346_v18 }
 0x288   :  { %v350_v17 = vmul.f32 %v496_v16, %v342_v11 }
 0x28a   :  { %v353_v20 = vadd.f32 %v352_v15, %v350_v17 }
 0x28c   :  { %v354_v21 = vadd.f32 %v353_v20, %v351_v19 }
 0x28e   :  { %v355_v22 = vrot.slane %v354_v21, 4 }
 0x290   :  { %v356_v23 = vadd.f32 %v355_v22, %v354_v21 }
 0x292   :  { %v357_v24 = vrot.slane %v356_v23, 2 }
 0x294   :  { %v358_v25 = vadd.f32 %v357_v24, %v356_v23 }
 0x296   :  { %v359_v26 = vrot.slane %v358_v25, 1 }
 0x298   :  { %v360_v28 = vadd.f32 %v359_v26, %v358_v25 }
 0x29a   :  { %v365_v29 = vadd.f32 %v363_v27, %v360_v28 }
 0x29c   :  { %366 = vst [vmem:[#allocation5] sm:$0x1] %v365_v29 }
 0x29d   :  { %530 = shalt.err (!%p527_p12)
}
 0x29e   :  { %s531_s12 = scalar_lea.hbm %s654_s3, 16 }
 0x29f   :  { %p532_p13 = scmp.ne.s32.totalorder %s654_s3, %s531_s12  ;;  %p535_p0 = scmp.lt.u32.totalorder %s531_s12, %s654_s3 }
 0x2a1   :  { %p537_p1 = pnand %p535_p0, %p532_p13 }
 0x2a3   :  { %540 = shalt.err (!%p537_p1)
}
 0x2a4   :  { %376 = dma.vmem_to_hbm [thread:$0]  %s374_s7, 16, %s654_s3, [#allocation4]  }
 0x2a5   :  { %543 = dma.done.wait [#allocation4], 16  }
 0x2a6   :  { %544 = vsyncadd [#allocation4], 4294967280 }
 0x2a7   :  { %380 = vsyncpa [#allocation3], 1 }
 0x2a8   :  { %381 = vsyncpa [#allocation4], 1 }

</bundles_post_ra>
